<compile_context>
chip_gen: v7x
topology: tpu7x:2x2x1
jax: 0.10.0
libtpu: 0.0.40
codegen_flags: <defaults>
</compile_context>

<pallas_src>
import functools

import jax
import jax.numpy as jnp
from jax.experimental import pallas as pl
from jax.experimental.pallas import tpu as pltpu


def _round_up(x: int, m: int) -> int:
    return (x + m - 1) // m * m


def _sublane_tile(dtype) -> int:
    # second-minor tiling requirement: 8 for 4-byte, 16 for 2-byte, 32 for 1-byte
    return max(8, 32 // jnp.dtype(dtype).itemsize)


def _dice_sums_kernel(p_ref, t_ref, num_ref, den_ref, *, p_pow):
    """Accumulate per-row sum(p*t) and sum(p**p_pow + t**p_pow) over D tiles."""
    k = pl.program_id(1)

    @pl.when(k == 0)
    def _():
        num_ref[...] = jnp.zeros_like(num_ref)
        den_ref[...] = jnp.zeros_like(den_ref)

    pred = p_ref[...].astype(jnp.float32)
    targ = t_ref[...].astype(jnp.float32)

    # num: elementwise product then row reduce (first stage is pure VALU adds,
    # final 128-lane reduce goes to the XLU slot -- hidden under HBM streaming).
    num_ref[...] += jnp.sum(pred * targ, axis=1, keepdims=True)

    # Small integer powers -> VPU multiplies (exact, no EUP exp/log, no NaN at 0).
    p_int = int(p_pow) if float(p_pow) == int(p_pow) else None
    if p_int == 1:
        den_part = pred + targ
    elif p_int is not None and 2 <= p_int <= 16:
        pp, tp = pred, targ
        for _ in range(p_int - 1):
            pp = pp * pred
            tp = tp * targ
        den_part = pp + tp
    else:
        den_part = jnp.power(pred, p_pow) + jnp.power(targ, p_pow)
    den_ref[...] += jnp.sum(den_part, axis=1, keepdims=True)


def binary_dice_loss(predict, target, smooth=1.0, p=2, reduction="mean",
                     target_block_bytes=2 << 20, max_rows_per_block=256):
    assert predict.shape[0] == target.shape[0], "predict & target batch size don't match"
    n = predict.shape[0]
    pred2d = predict.reshape(n, -1)
    targ2d = target.reshape(n, -1)
    d = pred2d.shape[1]

    # ---- pack sublanes for small N: fold part of D into the row axis --------
    fold = 1
    while n * fold < 8 and fold < 8 and d % (fold * 2) == 0:
        fold *= 2
    r = n * fold
    df = d // fold
    pred2d = pred2d.reshape(r, df)   # contiguous reshape: free
    targ2d = targ2d.reshape(r, df)

    # ---- tile selection ------------------------------------------------------
    base_sub = max(_sublane_tile(pred2d.dtype), _sublane_tile(targ2d.dtype))
    itemsize = max(jnp.dtype(pred2d.dtype).itemsize, jnp.dtype(targ2d.dtype).itemsize)

    r_pad = _round_up(r, base_sub)
    # rows per block: largest multiple of base_sub <= cap that divides r_pad
    tr = base_sub
    cand = (min(r_pad, max_rows_per_block) // base_sub) * base_sub
    while cand >= base_sub:
        if r_pad % cand == 0:
            tr = cand
            break
        cand -= base_sub

    df128 = _round_up(df, 128)
    nl = df128 // 128
    tk_units_cap = max(1, min(target_block_bytes // (tr * itemsize * 128), nl))
    # prefer a lane tile that divides the (128-rounded) D to avoid extra padding,
    # unless that shrinks the tile by more than 2x.
    div = 1
    for u in range(tk_units_cap, 0, -1):
        if nl % u == 0:
            div = u
            break
    tk_units = div if div * 2 >= tk_units_cap else tk_units_cap
    tk = tk_units * 128
    d_total = _round_up(df128, tk)

    # ---- zero-pad up to the tile grid (exact: pads add 0 to num and den) -----
    if r_pad != r or d_total != df:
        pred2d = jnp.pad(pred2d, ((0, r_pad - r), (0, d_total - df)))
        targ2d = jnp.pad(targ2d, ((0, r_pad - r), (0, d_total - df)))

    grid = (r_pad // tr, d_total // tk)
    kernel = functools.partial(_dice_sums_kernel, p_pow=p)

    num_rows, den_rows = pl.pallas_call(
        kernel,
        out_shape=(
            jax.ShapeDtypeStruct((r_pad, 1), jnp.float32),
            jax.ShapeDtypeStruct((r_pad, 1), jnp.float32),
        ),
        grid_spec=pltpu.PrefetchScalarGridSpec(
            num_scalar_prefetch=0,
            grid=grid,
            in_specs=[
                pl.BlockSpec((tr, tk), lambda i, k: (i, k)),
                pl.BlockSpec((tr, tk), lambda i, k: (i, k)),
            ],
            out_specs=[
                pl.BlockSpec((tr, 1), lambda i, k: (i, 0)),
                pl.BlockSpec((tr, 1), lambda i, k: (i, 0)),
            ],
        ),
        compiler_params=pltpu.CompilerParams(
            dimension_semantics=("parallel", "arbitrary"),
            vmem_limit_bytes=32 * 1024 * 1024,
        ),
    )(pred2d, targ2d)

    # ---- epilogue: unfold rows, add smooth, divide, reduce --------------------
    num = num_rows[:r, 0].reshape(n, fold).sum(axis=1) + smooth
    den = den_rows[:r, 0].reshape(n, fold).sum(axis=1) + smooth
    loss = 1.0 - num / den

    if reduction == "mean":
        return jnp.mean(loss)
    elif reduction == "sum":
        return jnp.sum(loss)
    elif reduction == "none":
        return loss
    else:
        raise Exception("Unexpected reduction {}".format(reduction))


if __name__ == "__main__":
    key = jax.random.PRNGKey(0)
    k1, k2 = jax.random.split(key)
    # small NCHW-shaped inputs: batch=2, channels=4, spatial=16
    predict = jax.nn.sigmoid(jax.random.normal(k1, (2, 4, 16, 16), dtype=jnp.float32))
    target = (jax.random.uniform(k2, (2, 4, 16, 16)) > 0.5).astype(jnp.float32)

    loss = binary_dice_loss(predict, target, smooth=1.0, p=2, reduction="mean")
    jax.block_until_ready(loss)

    # reference check in plain JAX
    p2 = predict.reshape(2, -1)
    t2 = target.reshape(2, -1)
    num = jnp.sum(p2 * t2, axis=1) + 1.0
    den = jnp.sum(p2 ** 2 + t2 ** 2, axis=1) + 1.0
    ref = jnp.mean(1.0 - num / den)
    assert jnp.allclose(loss, ref, rtol=1e-5, atol=1e-5), (loss, ref)

    # also exercise 'none' and 'sum' reductions once (cheap, same kernel)
    loss_none = binary_dice_loss(predict, target, reduction="none")
    loss_sum = binary_dice_loss(predict, target, reduction="sum")
    jax.block_until_ready((loss_none, loss_sum))
    assert jnp.allclose(loss_none.mean(), ref, rtol=1e-5, atol=1e-5)
    assert jnp.allclose(loss_sum, loss_none.sum(), rtol=1e-5, atol=1e-5)

    print("KERNEL_OK")
</pallas_src>

<mosaic_0001>
module attributes {stable_mosaic.version = 11 : i64} {
  func.func @_dice_sums_kernel(%arg0: i32, %arg1: i32, %arg2: memref<8x256xf32, #tpu.memory_space<vmem>>, %arg3: memref<8x256xf32, #tpu.memory_space<vmem>>, %arg4: memref<8x1xf32, #tpu.memory_space<vmem>>, %arg5: memref<8x1xf32, #tpu.memory_space<vmem>>) attributes {dimension_semantics = [#tpu.dimension_semantics<parallel>, #tpu.dimension_semantics<arbitrary>], iteration_bounds = array<i64: 1, 1>, scalar_prefetch = 0 : i64, scratch_operands = 0 : i64, tpu.core_type = #tpu.core_type<tc>, window_params = [{transform_indices = @transform_0, window_bounds = array<i64: 8, 256>}, {transform_indices = @transform_1, window_bounds = array<i64: 8, 256>}, {transform_indices = @transform_2, window_bounds = array<i64: 8, 1>}, {transform_indices = @transform_3, window_bounds = array<i64: 8, 1>}]} {
    %c0_i32 = arith.constant 0 : i32
    %0 = arith.cmpi eq, %arg1, %c0_i32 : i32
    %1 = arith.extui %0 : i1 to i32
    %c0_i32_0 = arith.constant 0 : i32
    %2 = arith.cmpi ne, %1, %c0_i32_0 : i32
    scf.if %2 {
      %cst_13 = arith.constant 0.000000e+00 : f32
      %19 = vector.broadcast %cst_13 : f32 to vector<8x1xf32>
      %c0_14 = arith.constant 0 : index
      %c0_15 = arith.constant 0 : index
      %20 = vector.load %arg4[%c0_14, %c0_15] : memref<8x1xf32, #tpu.memory_space<vmem>>, vector<8x1xf32>
      tpu.vector_store %arg4[%c0_14, %c0_15], %19 {strides = array<i32>} : memref<8x1xf32, #tpu.memory_space<vmem>>, vector<8x1xf32>,
      %cst_16 = arith.constant 0.000000e+00 : f32
      %21 = vector.broadcast %cst_16 : f32 to vector<8x1xf32>
      %c0_17 = arith.constant 0 : index
      %c0_18 = arith.constant 0 : index
      %22 = vector.load %arg5[%c0_17, %c0_18] : memref<8x1xf32, #tpu.memory_space<vmem>>, vector<8x1xf32>
      tpu.vector_store %arg5[%c0_17, %c0_18], %21 {strides = array<i32>} : memref<8x1xf32, #tpu.memory_space<vmem>>, vector<8x1xf32>,
    } else {
    }
    %c0 = arith.constant 0 : index
    %c0_1 = arith.constant 0 : index
    %3 = vector.load %arg2[%c0, %c0_1] : memref<8x256xf32, #tpu.memory_space<vmem>>, vector<8x256xf32>
    %c0_2 = arith.constant 0 : index
    %c0_3 = arith.constant 0 : index
    %4 = vector.load %arg3[%c0_2, %c0_3] : memref<8x256xf32, #tpu.memory_space<vmem>>, vector<8x256xf32>
    %c0_4 = arith.constant 0 : index
    %c0_5 = arith.constant 0 : index
    %5 = vector.load %arg4[%c0_4, %c0_5] : memref<8x1xf32, #tpu.memory_space<vmem>>, vector<8x1xf32>
    %6 = arith.mulf %3, %4 : vector<8x256xf32>
    %cst = arith.constant dense<0.000000e+00> : vector<8xf32>
    %7 = vector.multi_reduction <add>, %6, %cst [1] : vector<8x256xf32> to vector<8xf32>
    %8 = vector.shape_cast %7 : vector<8xf32> to vector<8x1xf32>
    %9 = arith.addf %5, %8 : vector<8x1xf32>
    %c0_6 = arith.constant 0 : index
    %c0_7 = arith.constant 0 : index
    %10 = vector.load %arg4[%c0_6, %c0_7] : memref<8x1xf32, #tpu.memory_space<vmem>>, vector<8x1xf32>
    tpu.vector_store %arg4[%c0_6, %c0_7], %9 {strides = array<i32>} : memref<8x1xf32, #tpu.memory_space<vmem>>, vector<8x1xf32>,
    %11 = arith.mulf %3, %3 : vector<8x256xf32>
    %12 = arith.mulf %4, %4 : vector<8x256xf32>
    %13 = arith.addf %11, %12 : vector<8x256xf32>
    %c0_8 = arith.constant 0 : index
    %c0_9 = arith.constant 0 : index
    %14 = vector.load %arg5[%c0_8, %c0_9] : memref<8x1xf32, #tpu.memory_space<vmem>>, vector<8x1xf32>
    %cst_10 = arith.constant dense<0.000000e+00> : vector<8xf32>
    %15 = vector.multi_reduction <add>, %13, %cst_10 [1] : vector<8x256xf32> to vector<8xf32>
    %16 = vector.shape_cast %15 : vector<8xf32> to vector<8x1xf32>
    %17 = arith.addf %14, %16 : vector<8x1xf32>
    %c0_11 = arith.constant 0 : index
    %c0_12 = arith.constant 0 : index
    %18 = vector.load %arg5[%c0_11, %c0_12] : memref<8x1xf32, #tpu.memory_space<vmem>>, vector<8x1xf32>
    tpu.vector_store %arg5[%c0_11, %c0_12], %17 {strides = array<i32>} : memref<8x1xf32, #tpu.memory_space<vmem>>, vector<8x1xf32>,
    return
  }
  func.func @transform_0(%arg0: i32, %arg1: i32) -> (i32, i32) {
    %c0_i32 = arith.constant 0 : i32
    return %arg0, %arg1 : i32, i32
  }
  func.func @transform_1(%arg0: i32, %arg1: i32) -> (i32, i32) {
    %c0_i32 = arith.constant 0 : i32
    return %arg0, %arg1 : i32, i32
  }
  func.func @transform_2(%arg0: i32, %arg1: i32) -> (i32, i32) {
    %c0_i32 = arith.constant 0 : i32
    %c0_i32_0 = arith.constant 0 : i32
    return %arg0, %c0_i32 : i32, i32
  }
  func.func @transform_3(%arg0: i32, %arg1: i32) -> (i32, i32) {
    %c0_i32 = arith.constant 0 : i32
    %c0_i32_0 = arith.constant 0 : i32
    return %arg0, %c0_i32 : i32, i32
  }
}

</mosaic_0001>

<bundles_post_ra>
// kernel: tpu_custom_call.1
= control target key start
LH: loop header
LB: loop body
LE: loop exit
PB: predicated region body
PF: predicated region fallthrough
CT: control target
= control target key end

     0   :  { %9 = vsyncpa [#allocation3], 0  ;;  %s199_s0 = inlined_call_operand.hbm [shape: f32[8,256], index: 0, kind: input, shape index: {}]   ;;  %s200_s1 = inlined_call_operand.hbm [shape: f32[8,256], index: 1, kind: input, shape index: {}]   ;;  %s201_s2 = inlined_call_operand.vmem [shape: f32[8,1], index: 2, kind: output, shape index: {0}]   ;;  %s202_s3 = inlined_call_operand.vmem [shape: f32[8,1], index: 3, kind: output, shape index: {1}]  }
   0x1   :  { %10 = vsyncpa [#allocation5], 0  ;;  %s130_s12 = smov [#allocation2]   ;;  %s131_s14 = smov [#allocation4]  }
   0x2   :  { %s17_s13 = sshll.u32 %s130_s12, 4  ;;  %s27_s15 = sshll.u32 %s131_s14, 4  ;;  %s18_s13 = int_to_ptr.vmem [resolvable:$true] %s17_s13  ;;  %s28_s15 = int_to_ptr.vmem [resolvable:$true] %s27_s15 }
   0x3   :  { %s82_s18 = scalar_lea.hbm %s199_s0, 256 }
   0x4   :  { %p83_p0 = scmp.ne.s32.totalorder %s199_s0, %s82_s18  ;;  %p86_p1 = scmp.lt.u32.totalorder %s82_s18, %s199_s0 }
   0x6   :  { %p88_p2 = pnand %p86_p1, %p83_p0 }
   0x8   :  { %91 = shalt.err (!%p88_p2)
}
   0x9   :  { %s92_s23 = scalar_lea.vmem %s18_s13, 256  ;;  %p97_p4 = scmp.lt.s32.totalorder %s18_s13, %s18_s13 }
   0xa   :  { %p93_p3 = scmp.ne.s32.totalorder %s18_s13, %s92_s23  ;;  %p98_p5 = scmp.lt.s32.totalorder %s92_s23, %s92_s23 }
   0xc   :  { %p99_p6 = por %p98_p5, %p97_p4 }
   0xe   :  { %p100_p7 = pnand %p99_p6, %p93_p3 }
  0x10   :  { %103 = shalt.err (!%p100_p7)
}
  0x11   :  { %20 = dma.hbm_to_vmem [thread:$0]  %s199_s0, 256, %s18_s13, [#allocation3]  }
  0x12   :  { %s104_s28 = scalar_lea.hbm %s200_s1, 256 }
  0x13   :  { %p105_p8 = scmp.ne.s32.totalorder %s200_s1, %s104_s28  ;;  %p108_p9 = scmp.lt.u32.totalorder %s104_s28, %s200_s1 }
  0x15   :  { %p110_p10 = pnand %p108_p9, %p105_p8 }
  0x17   :  { %113 = shalt.err (!%p110_p10)
}
  0x18   :  { %s114_s6 = scalar_lea.vmem %s28_s15, 256  ;;  %p119_p12 = scmp.lt.s32.totalorder %s28_s15, %s28_s15 }
  0x19   :  { %p115_p11 = scmp.ne.s32.totalorder %s28_s15, %s114_s6  ;;  %p120_p13 = scmp.lt.s32.totalorder %s114_s6, %s114_s6 }
  0x1b   :  { %p121_p0 = por %p120_p13, %p119_p12 }
  0x1d   :  { %p122_p1 = pnand %p121_p0, %p115_p11 }
  0x1f   :  { %125 = shalt.err (!%p122_p1)
}
  0x20   :  { %30 = dma.hbm_to_vmem [thread:$0]  %s200_s1, 256, %s28_s15, [#allocation5]  }
  0x21   :  { %126 = dma.done.wait [#allocation3], 256  }
  0x22   :  { %127 = vsyncadd [#allocation3], 4294967040 }
  0x23   :  { %128 = dma.done.wait [#allocation5], 256  }
  0x24   :  { %129 = vsyncadd [#allocation5], 4294967040  ;;  %vm41_vm0 = vcmask 7168   ;;  %v132_v0 = vmov 0.0   ;;  %v44_v1 = vld [vmem:[#allocation2] sm:$0xff]  ;;  %v45_v2 = vld [vmem:[#allocation2 + $0x8] sm:$0xff] }
  0x25   :  { %42 = vst.msk [vmem:[%s201_s2] sm:$0xff] %vm41_vm0, %v132_v0  ;;  %43 = vst.msk [vmem:[%s202_s3] sm:$0xff] %vm41_vm0, %v132_v0  ;;  %v46_v3 = vld [vmem:[#allocation4] sm:$0xff]  ;;  %v47_v4 = vld [vmem:[#allocation4 + $0x8] sm:$0xff]  ;;  %v57_v6 = vmul.f32 %v44_v1, %v44_v1  ;;  %v58_v7 = vmul.f32 %v45_v2, %v45_v2 }
  0x26   :  { %v49_v5 = vmul.f32 %v46_v3, %v44_v1  ;;  %v59_v8 = vmul.f32 %v46_v3, %v46_v3  ;;  %v50_v9 = vmul.f32 %v47_v4, %v45_v2  ;;  %v60_v10 = vmul.f32 %v47_v4, %v47_v4 }
  0x28   :  { %v61_v11 = vadd.f32 %v59_v8, %v57_v6  ;;  %v51_v12 = vadd.f32 %v50_v9, %v49_v5  ;;  %v62_v13 = vadd.f32 %v60_v10, %v58_v7 }
  0x2a   :  { %52 = vadd.xlane.f32.xlu0 %v51_v12  ;;  %v64_v14 = vadd.f32 %v62_v13, %v61_v11 }
  0x2c   :  { %v48_v15 = vld [vmem:[%s201_s2] sm:$0xff] }
  0x2d   :  { %v63_v18 = vld [vmem:[%s202_s3] sm:$0xff] }
  0x2e   :  { %65 = vadd.xlane.f32.xlu0 %v64_v14 }
  0xb7   :  { %v53_v16 = vpop.xlane.xlu0 %52 }
  0xb8   :  { %v54_v17 = vadd.f32 %v53_v16, %v48_v15 }
  0xba   :  { %56 = vst.msk [vmem:[%s201_s2] sm:$0xff] %vm41_vm0, %v54_v17 }
  0xbb   :  { %v66_v19 = vpop.xlane.xlu0 %65 }
  0xbc   :  { %v67_v20 = vadd.f32 %v66_v19, %v63_v18 }
  0xbe   :  { %68 = vst.msk [vmem:[%s202_s3] sm:$0xff] %vm41_vm0, %v67_v20 }
  0xbf   :  { %77 = vsyncpa [#allocation3], 1 }
  0xc0   :  { %78 = vsyncpa [#allocation5], 1 }

</bundles_post_ra>
